<compile_context>
chip_gen: v5e
topology: v5e:2x2
jax: 0.10.0
libtpu: 0.0.40
codegen_flags: <defaults>
</compile_context>

<pallas_src>
import functools
import math

import jax
import jax.numpy as jnp
from jax.experimental import pallas as pl
from jax.experimental.pallas import tpu as pltpu


def _mha_kernel(x_ref, wqkv_ref, bqkv_ref, wo_ref, bo_ref, o_ref, *, head):
    S, D = x_ref.shape[1], x_ref.shape[2]
    d_k = D // head

    x = x_ref[0]                                                 # (S, D) bf16

    # Fused QKV projection: one full-width MXU dot.  1/sqrt(d_k) is already folded
    # into the Q columns of wqkv / bqkv on the host.  bf16 operands, f32 accum.
    qkv = jnp.dot(x, wqkv_ref[...],
                  preferred_element_type=jnp.float32) + bqkv_ref[...]   # (S, 3D) f32

    ctx_parts = []
    for h in range(head):                                        # static unroll
        lo = h * d_k
        q_h = qkv[:, lo:lo + d_k].astype(jnp.bfloat16)           # (S, d_k)
        k_h = qkv[:, D + lo:D + lo + d_k].astype(jnp.bfloat16)
        v_h = qkv[:, 2 * D + lo:2 * D + lo + d_k].astype(jnp.bfloat16)

        # scores = q_h @ k_h.T expressed by contracting axis 1 of both operands,
        # so no transpose is materialized in the kernel.
        s = jax.lax.dot_general(
            q_h, k_h,
            dimension_numbers=(((1,), (1,)), ((), ())),
            preferred_element_type=jnp.float32)                  # (S, S) f32

        # Numerically-stable softmax with DEFERRED normalization: the O(S^2) tile
        # is left un-normalized; the 1/denom scale is applied to the (S, d_k)
        # context instead (EUP reciprocal, free slot).
        s_max = jnp.max(s, axis=-1, keepdims=True)
        p = jnp.exp(s - s_max)
        denom = jnp.sum(p, axis=-1, keepdims=True)               # (S, 1)

        ctx_h = jnp.dot(p.astype(jnp.bfloat16), v_h,
                        preferred_element_type=jnp.float32)      # (S, d_k) f32
        ctx_h = ctx_h * pl.reciprocal(denom, approx=True)
        ctx_parts.append(ctx_h.astype(jnp.bfloat16))

    ctx = jnp.concatenate(ctx_parts, axis=-1)                    # (S, D) bf16

    # Fused output projection: one (S,D)x(D,D) dot, bias add, single store.
    out = jnp.dot(ctx, wo_ref[...],
                  preferred_element_type=jnp.float32) + bo_ref[...]
    o_ref[0] = out.astype(o_ref.dtype)


def multi_headed_attention(x, params, head: int):
    """x: (B, S, D) float32.  params: PyTorch-layout weights (out, in) / (1, out)."""
    B, S, D = x.shape
    assert D % head == 0
    d_k = D // head
    scale = 1.0 / math.sqrt(d_k)
    mxu = jnp.bfloat16

    # One-time host-side prep: fuse QKV, pre-transpose to (in, out), fold in the
    # softmax scale, cast MXU operands to bf16.  Biases stay f32 (added to f32 acc).
    wqkv = jnp.concatenate([params["wq"].T * scale,
                            params["wk"].T,
                            params["wv"].T], axis=1).astype(mxu)          # (D, 3D)
    bqkv = jnp.concatenate([params["bq"] * scale,
                            params["bk"],
                            params["bv"]], axis=1).astype(jnp.float32)    # (1, 3D)
    wo = params["wo"].T.astype(mxu)                                       # (D, D)
    bo = params["bo"].astype(jnp.float32)                                 # (1, D)

    kernel = functools.partial(_mha_kernel, head=head)

    return pl.pallas_call(
        kernel,
        out_shape=jax.ShapeDtypeStruct((B, S, D), x.dtype),
        grid_spec=pltpu.PrefetchScalarGridSpec(
            num_scalar_prefetch=0,
            grid=(B,),                                        # batch only; heads in-body
            in_specs=[
                pl.BlockSpec((1, S, D), lambda b: (b, 0, 0)),     # x
                pl.BlockSpec((D, 3 * D), lambda b: (0, 0)),       # fused Wqkv (resident)
                pl.BlockSpec((1, 3 * D), lambda b: (0, 0)),       # fused bqkv (resident)
                pl.BlockSpec((D, D), lambda b: (0, 0)),           # Wo (resident)
                pl.BlockSpec((1, D), lambda b: (0, 0)),           # bo (resident)
            ],
            out_specs=pl.BlockSpec((1, S, D), lambda b: (b, 0, 0)),
        ),
        compiler_params=pltpu.CompilerParams(
            dimension_semantics=("parallel",),
            vmem_limit_bytes=48 * 1024 * 1024),        # safe across v5e/v6e/v7x
    )(x.astype(mxu), wqkv, bqkv, wo, bo)


def reference_mha(x, params, head: int, mxu_dtype=jnp.float32):
    """Pure-JAX reference mirroring the PyTorch forward.

    With mxu_dtype=jnp.bfloat16 it also mirrors the kernel's policy of feeding the
    MXU bf16 operands with f32 accumulation (tight implementation check).
    """
    B, S, D = x.shape
    d_k = D // head
    c = lambda a: a.astype(mxu_dtype)

    def lin(t, w, b):
        return jnp.dot(c(t), c(w).T, preferred_element_type=jnp.float32) + b

    q = lin(x, params["wq"], params["bq"][0]).reshape(B, S, head, d_k).transpose(0, 2, 1, 3)
    k = lin(x, params["wk"], params["bk"][0]).reshape(B, S, head, d_k).transpose(0, 2, 1, 3)
    v = lin(x, params["wv"], params["bv"][0]).reshape(B, S, head, d_k).transpose(0, 2, 1, 3)

    scores = jnp.einsum("bhqd,bhkd->bhqk", c(q), c(k),
                        preferred_element_type=jnp.float32) / math.sqrt(d_k)
    p = jax.nn.softmax(scores, axis=-1)
    ctx = jnp.einsum("bhqk,bhkd->bhqd", c(p), c(v),
                     preferred_element_type=jnp.float32)
    ctx = ctx.transpose(0, 2, 1, 3).reshape(B, S, D)
    return lin(ctx, params["wo"], params["bo"][0])


def init_params(key, dim: int):
    """Deterministic synthetic parameters (PyTorch nn.Linear shapes)."""
    keys = jax.random.split(key, 8)
    s = 1.0 / math.sqrt(dim)

    def w(k):
        return jax.random.uniform(k, (dim, dim), jnp.float32, -s, s)

    def b(k):
        return jax.random.uniform(k, (1, dim), jnp.float32, -s, s)

    return {
        "wq": w(keys[0]), "bq": b(keys[1]),
        "wk": w(keys[2]), "bk": b(keys[3]),
        "wv": w(keys[4]), "bv": b(keys[5]),
        "wo": w(keys[6]), "bo": b(keys[7]),
    }


if __name__ == "__main__":
    B, S, D, HEAD = 2, 8, 32, 4          # dim % head == 0, d_k = 8

    key = jax.random.PRNGKey(0)
    kx, kp = jax.random.split(key)
    x = jax.random.normal(kx, (B, S, D), jnp.float32)
    params = init_params(kp, D)

    out = multi_headed_attention(x, params, HEAD)
    out = jax.block_until_ready(out)
    assert out.shape == (B, S, D)

    # Tight check vs. a reference that mirrors the kernel's bf16-MXU-operand policy.
    ref_bf16 = reference_mha(x, params, HEAD, mxu_dtype=jnp.bfloat16)
    err_bf16 = float(jnp.max(jnp.abs(out - ref_bf16)))
    assert jnp.allclose(out, ref_bf16, atol=3e-2, rtol=3e-2), \
        f"bf16-matched max abs err {err_bf16}"

    # Semantics check vs. the pure-f32 PyTorch-equivalent forward (bf16 MXU-input
    # rounding bounds the residual error).
    ref_f32 = reference_mha(x, params, HEAD, mxu_dtype=jnp.float32)
    err_f32 = float(jnp.max(jnp.abs(out - ref_f32)))
    assert jnp.allclose(out, ref_f32, atol=1e-1, rtol=1e-1), \
        f"f32 max abs err {err_f32}"

    print("KERNEL_OK")
</pallas_src>

<mosaic_0001>
module attributes {stable_mosaic.version = 11 : i64} {
  func.func @_mha_kernel(%arg0: i32, %arg1: memref<1x8x32xbf16, #tpu.memory_space<vmem>>, %arg2: memref<32x96xbf16, #tpu.memory_space<vmem>>, %arg3: memref<1x96xf32, #tpu.memory_space<vmem>>, %arg4: memref<32x32xbf16, #tpu.memory_space<vmem>>, %arg5: memref<1x32xf32, #tpu.memory_space<vmem>>, %arg6: memref<1x8x32xf32, #tpu.memory_space<vmem>>) attributes {dimension_semantics = [#tpu.dimension_semantics<parallel>], iteration_bounds = array<i64: 2>, scalar_prefetch = 0 : i64, scratch_operands = 0 : i64, tpu.core_type = #tpu.core_type<tc>, window_params = [{transform_indices = @transform_0, window_bounds = array<i64: 1, 8, 32>}, {pipeline_mode = #tpu.pipeline_mode<synchronous>, transform_indices = @transform_1, window_bounds = array<i64: 32, 96>}, {pipeline_mode = #tpu.pipeline_mode<synchronous>, transform_indices = @transform_2, window_bounds = array<i64: 1, 96>}, {pipeline_mode = #tpu.pipeline_mode<synchronous>, transform_indices = @transform_3, window_bounds = array<i64: 32, 32>}, {pipeline_mode = #tpu.pipeline_mode<synchronous>, transform_indices = @transform_4, window_bounds = array<i64: 1, 32>}, {transform_indices = @transform_5, window_bounds = array<i64: 1, 8, 32>}]} {
    %c0 = arith.constant 0 : index
    %c0_0 = arith.constant 0 : index
    %c0_1 = arith.constant 0 : index
    %0 = vector.load %arg1[%c0, %c0_0, %c0_1] : memref<1x8x32xbf16, #tpu.memory_space<vmem>>, vector<1x8x32xbf16>
    %1 = vector.shape_cast %0 : vector<1x8x32xbf16> to vector<8x32xbf16>
    %c0_2 = arith.constant 0 : index
    %c0_3 = arith.constant 0 : index
    %2 = vector.load %arg2[%c0_2, %c0_3] : memref<32x96xbf16, #tpu.memory_space<vmem>>, vector<32x96xbf16>
    %cst = arith.constant dense<0.000000e+00> : vector<8x96xf32>
    %3 = tpu.matmul %1, %2, %cst {dimension_numbers = #tpu.dot_dimension_numbers<[1], [0], [0], [1], [0, 0, 1, 1], [], []>} : vector<8x32xbf16>, vector<32x96xbf16>, vector<8x96xf32> -> vector<8x96xf32>
    %c0_4 = arith.constant 0 : index
    %c0_5 = arith.constant 0 : index
    %4 = vector.load %arg3[%c0_4, %c0_5] : memref<1x96xf32, #tpu.memory_space<vmem>>, vector<1x96xf32>
    %5 = vector.broadcast %4 : vector<1x96xf32> to vector<8x96xf32>
    %6 = arith.addf %3, %5 : vector<8x96xf32>
    %7 = vector.extract_strided_slice %6 {offsets = [0, 0], sizes = [8, 8], strides = [1, 1]} : vector<8x96xf32> to vector<8x8xf32>
    %8 = arith.truncf %7 : vector<8x8xf32> to vector<8x8xbf16>
    %9 = vector.extract_strided_slice %6 {offsets = [0, 32], sizes = [8, 8], strides = [1, 1]} : vector<8x96xf32> to vector<8x8xf32>
    %10 = arith.truncf %9 : vector<8x8xf32> to vector<8x8xbf16>
    %11 = vector.extract_strided_slice %6 {offsets = [0, 64], sizes = [8, 8], strides = [1, 1]} : vector<8x96xf32> to vector<8x8xf32>
    %12 = arith.truncf %11 : vector<8x8xf32> to vector<8x8xbf16>
    %cst_6 = arith.constant dense<0.000000e+00> : vector<8x8xf32>
    %13 = tpu.matmul %8, %10, %cst_6 {dimension_numbers = #tpu.dot_dimension_numbers<[1], [1], [0], [0], [0, 0, 1, 0], [], []>} : vector<8x8xbf16>, vector<8x8xbf16>, vector<8x8xf32> -> vector<8x8xf32>
    %cst_7 = arith.constant dense<0xFF800000> : vector<8xf32>
    %14 = vector.multi_reduction <maximumf>, %13, %cst_7 [1] : vector<8x8xf32> to vector<8xf32>
    %15 = vector.shape_cast %14 : vector<8xf32> to vector<8x1xf32>
    %16 = vector.broadcast %15 : vector<8x1xf32> to vector<8x8xf32>
    %17 = arith.subf %13, %16 : vector<8x8xf32>
    %18 = math.exp %17 : vector<8x8xf32>
    %cst_8 = arith.constant dense<0.000000e+00> : vector<8xf32>
    %19 = vector.multi_reduction <add>, %18, %cst_8 [1] : vector<8x8xf32> to vector<8xf32>
    %20 = vector.shape_cast %19 : vector<8xf32> to vector<8x1xf32>
    %21 = arith.truncf %18 : vector<8x8xf32> to vector<8x8xbf16>
    %cst_9 = arith.constant dense<0.000000e+00> : vector<8x8xf32>
    %22 = tpu.matmul %21, %12, %cst_9 {dimension_numbers = #tpu.dot_dimension_numbers<[1], [0], [0], [1], [0, 0, 1, 1], [], []>} : vector<8x8xbf16>, vector<8x8xbf16>, vector<8x8xf32> -> vector<8x8xf32>
    %23 = tpu.reciprocal %20 {approx = true} : vector<8x1xf32> -> vector<8x1xf32>
    %24 = vector.broadcast %23 : vector<8x1xf32> to vector<8x8xf32>
    %25 = arith.mulf %22, %24 : vector<8x8xf32>
    %26 = arith.truncf %25 : vector<8x8xf32> to vector<8x8xbf16>
    %27 = vector.extract_strided_slice %6 {offsets = [0, 8], sizes = [8, 8], strides = [1, 1]} : vector<8x96xf32> to vector<8x8xf32>
    %28 = arith.truncf %27 : vector<8x8xf32> to vector<8x8xbf16>
    %29 = vector.extract_strided_slice %6 {offsets = [0, 40], sizes = [8, 8], strides = [1, 1]} : vector<8x96xf32> to vector<8x8xf32>
    %30 = arith.truncf %29 : vector<8x8xf32> to vector<8x8xbf16>
    %31 = vector.extract_strided_slice %6 {offsets = [0, 72], sizes = [8, 8], strides = [1, 1]} : vector<8x96xf32> to vector<8x8xf32>
    %32 = arith.truncf %31 : vector<8x8xf32> to vector<8x8xbf16>
    %cst_10 = arith.constant dense<0.000000e+00> : vector<8x8xf32>
    %33 = tpu.matmul %28, %30, %cst_10 {dimension_numbers = #tpu.dot_dimension_numbers<[1], [1], [0], [0], [0, 0, 1, 0], [], []>} : vector<8x8xbf16>, vector<8x8xbf16>, vector<8x8xf32> -> vector<8x8xf32>
    %cst_11 = arith.constant dense<0xFF800000> : vector<8xf32>
    %34 = vector.multi_reduction <maximumf>, %33, %cst_11 [1] : vector<8x8xf32> to vector<8xf32>
    %35 = vector.shape_cast %34 : vector<8xf32> to vector<8x1xf32>
    %36 = vector.broadcast %35 : vector<8x1xf32> to vector<8x8xf32>
    %37 = arith.subf %33, %36 : vector<8x8xf32>
    %38 = math.exp %37 : vector<8x8xf32>
    %cst_12 = arith.constant dense<0.000000e+00> : vector<8xf32>
    %39 = vector.multi_reduction <add>, %38, %cst_12 [1] : vector<8x8xf32> to vector<8xf32>
    %40 = vector.shape_cast %39 : vector<8xf32> to vector<8x1xf32>
    %41 = arith.truncf %38 : vector<8x8xf32> to vector<8x8xbf16>
    %cst_13 = arith.constant dense<0.000000e+00> : vector<8x8xf32>
    %42 = tpu.matmul %41, %32, %cst_13 {dimension_numbers = #tpu.dot_dimension_numbers<[1], [0], [0], [1], [0, 0, 1, 1], [], []>} : vector<8x8xbf16>, vector<8x8xbf16>, vector<8x8xf32> -> vector<8x8xf32>
    %43 = tpu.reciprocal %40 {approx = true} : vector<8x1xf32> -> vector<8x1xf32>
    %44 = vector.broadcast %43 : vector<8x1xf32> to vector<8x8xf32>
    %45 = arith.mulf %42, %44 : vector<8x8xf32>
    %46 = arith.truncf %45 : vector<8x8xf32> to vector<8x8xbf16>
    %47 = vector.extract_strided_slice %6 {offsets = [0, 16], sizes = [8, 8], strides = [1, 1]} : vector<8x96xf32> to vector<8x8xf32>
    %48 = arith.truncf %47 : vector<8x8xf32> to vector<8x8xbf16>
    %49 = vector.extract_strided_slice %6 {offsets = [0, 48], sizes = [8, 8], strides = [1, 1]} : vector<8x96xf32> to vector<8x8xf32>
    %50 = arith.truncf %49 : vector<8x8xf32> to vector<8x8xbf16>
    %51 = vector.extract_strided_slice %6 {offsets = [0, 80], sizes = [8, 8], strides = [1, 1]} : vector<8x96xf32> to vector<8x8xf32>
    %52 = arith.truncf %51 : vector<8x8xf32> to vector<8x8xbf16>
    %cst_14 = arith.constant dense<0.000000e+00> : vector<8x8xf32>
    %53 = tpu.matmul %48, %50, %cst_14 {dimension_numbers = #tpu.dot_dimension_numbers<[1], [1], [0], [0], [0, 0, 1, 0], [], []>} : vector<8x8xbf16>, vector<8x8xbf16>, vector<8x8xf32> -> vector<8x8xf32>
    %cst_15 = arith.constant dense<0xFF800000> : vector<8xf32>
    %54 = vector.multi_reduction <maximumf>, %53, %cst_15 [1] : vector<8x8xf32> to vector<8xf32>
    %55 = vector.shape_cast %54 : vector<8xf32> to vector<8x1xf32>
    %56 = vector.broadcast %55 : vector<8x1xf32> to vector<8x8xf32>
    %57 = arith.subf %53, %56 : vector<8x8xf32>
    %58 = math.exp %57 : vector<8x8xf32>
    %cst_16 = arith.constant dense<0.000000e+00> : vector<8xf32>
    %59 = vector.multi_reduction <add>, %58, %cst_16 [1] : vector<8x8xf32> to vector<8xf32>
    %60 = vector.shape_cast %59 : vector<8xf32> to vector<8x1xf32>
    %61 = arith.truncf %58 : vector<8x8xf32> to vector<8x8xbf16>
    %cst_17 = arith.constant dense<0.000000e+00> : vector<8x8xf32>
    %62 = tpu.matmul %61, %52, %cst_17 {dimension_numbers = #tpu.dot_dimension_numbers<[1], [0], [0], [1], [0, 0, 1, 1], [], []>} : vector<8x8xbf16>, vector<8x8xbf16>, vector<8x8xf32> -> vector<8x8xf32>
    %63 = tpu.reciprocal %60 {approx = true} : vector<8x1xf32> -> vector<8x1xf32>
    %64 = vector.broadcast %63 : vector<8x1xf32> to vector<8x8xf32>
    %65 = arith.mulf %62, %64 : vector<8x8xf32>
    %66 = arith.truncf %65 : vector<8x8xf32> to vector<8x8xbf16>
    %67 = vector.extract_strided_slice %6 {offsets = [0, 24], sizes = [8, 8], strides = [1, 1]} : vector<8x96xf32> to vector<8x8xf32>
    %68 = arith.truncf %67 : vector<8x8xf32> to vector<8x8xbf16>
    %69 = vector.extract_strided_slice %6 {offsets = [0, 56], sizes = [8, 8], strides = [1, 1]} : vector<8x96xf32> to vector<8x8xf32>
    %70 = arith.truncf %69 : vector<8x8xf32> to vector<8x8xbf16>
    %71 = vector.extract_strided_slice %6 {offsets = [0, 88], sizes = [8, 8], strides = [1, 1]} : vector<8x96xf32> to vector<8x8xf32>
    %72 = arith.truncf %71 : vector<8x8xf32> to vector<8x8xbf16>
    %cst_18 = arith.constant dense<0.000000e+00> : vector<8x8xf32>
    %73 = tpu.matmul %68, %70, %cst_18 {dimension_numbers = #tpu.dot_dimension_numbers<[1], [1], [0], [0], [0, 0, 1, 0], [], []>} : vector<8x8xbf16>, vector<8x8xbf16>, vector<8x8xf32> -> vector<8x8xf32>
    %cst_19 = arith.constant dense<0xFF800000> : vector<8xf32>
    %74 = vector.multi_reduction <maximumf>, %73, %cst_19 [1] : vector<8x8xf32> to vector<8xf32>
    %75 = vector.shape_cast %74 : vector<8xf32> to vector<8x1xf32>
    %76 = vector.broadcast %75 : vector<8x1xf32> to vector<8x8xf32>
    %77 = arith.subf %73, %76 : vector<8x8xf32>
    %78 = math.exp %77 : vector<8x8xf32>
    %cst_20 = arith.constant dense<0.000000e+00> : vector<8xf32>
    %79 = vector.multi_reduction <add>, %78, %cst_20 [1] : vector<8x8xf32> to vector<8xf32>
    %80 = vector.shape_cast %79 : vector<8xf32> to vector<8x1xf32>
    %81 = arith.truncf %78 : vector<8x8xf32> to vector<8x8xbf16>
    %cst_21 = arith.constant dense<0.000000e+00> : vector<8x8xf32>
    %82 = tpu.matmul %81, %72, %cst_21 {dimension_numbers = #tpu.dot_dimension_numbers<[1], [0], [0], [1], [0, 0, 1, 1], [], []>} : vector<8x8xbf16>, vector<8x8xbf16>, vector<8x8xf32> -> vector<8x8xf32>
    %83 = tpu.reciprocal %80 {approx = true} : vector<8x1xf32> -> vector<8x1xf32>
    %84 = vector.broadcast %83 : vector<8x1xf32> to vector<8x8xf32>
    %85 = arith.mulf %82, %84 : vector<8x8xf32>
    %86 = arith.truncf %85 : vector<8x8xf32> to vector<8x8xbf16>
    %87 = tpu.concatenate %26, %46, %66, %86 in 1 : vector<8x8xbf16>, vector<8x8xbf16>, vector<8x8xbf16>, vector<8x8xbf16> -> vector<8x32xbf16>
    %c0_22 = arith.constant 0 : index
    %c0_23 = arith.constant 0 : index
    %88 = vector.load %arg4[%c0_22, %c0_23] : memref<32x32xbf16, #tpu.memory_space<vmem>>, vector<32x32xbf16>
    %cst_24 = arith.constant dense<0.000000e+00> : vector<8x32xf32>
    %89 = tpu.matmul %87, %88, %cst_24 {dimension_numbers = #tpu.dot_dimension_numbers<[1], [0], [0], [1], [0, 0, 1, 1], [], []>} : vector<8x32xbf16>, vector<32x32xbf16>, vector<8x32xf32> -> vector<8x32xf32>
    %c0_25 = arith.constant 0 : index
    %c0_26 = arith.constant 0 : index
    %90 = vector.load %arg5[%c0_25, %c0_26] : memref<1x32xf32, #tpu.memory_space<vmem>>, vector<1x32xf32>
    %91 = vector.broadcast %90 : vector<1x32xf32> to vector<8x32xf32>
    %92 = arith.addf %89, %91 : vector<8x32xf32>
    %c0_27 = arith.constant 0 : index
    %c0_28 = arith.constant 0 : index
    %c0_29 = arith.constant 0 : index
    %93 = vector.load %arg6[%c0_27, %c0_28, %c0_29] : memref<1x8x32xf32, #tpu.memory_space<vmem>>, vector<1x8x32xf32>
    %94 = vector.shape_cast %93 : vector<1x8x32xf32> to vector<8x32xf32>
    %95 = vector.shape_cast %92 : vector<8x32xf32> to vector<1x8x32xf32>
    tpu.vector_store %arg6[%c0_27, %c0_28, %c0_29], %95 {strides = array<i32>} : memref<1x8x32xf32, #tpu.memory_space<vmem>>, vector<1x8x32xf32>,
    return
  }
  func.func @transform_0(%arg0: i32) -> (i32, i32, i32) {
    %c0_i32 = arith.constant 0 : i32
    %c0_i32_0 = arith.constant 0 : i32
    %c0_i32_1 = arith.constant 0 : i32
    return %arg0, %c0_i32, %c0_i32_0 : i32, i32, i32
  }
  func.func @transform_1(%arg0: i32) -> (i32, i32) {
    %c0_i32 = arith.constant 0 : i32
    %c0_i32_0 = arith.constant 0 : i32
    %c0_i32_1 = arith.constant 0 : i32
    return %c0_i32, %c0_i32_0 : i32, i32
  }
  func.func @transform_2(%arg0: i32) -> (i32, i32) {
    %c0_i32 = arith.constant 0 : i32
    %c0_i32_0 = arith.constant 0 : i32
    %c0_i32_1 = arith.constant 0 : i32
    return %c0_i32, %c0_i32_0 : i32, i32
  }
  func.func @transform_3(%arg0: i32) -> (i32, i32) {
    %c0_i32 = arith.constant 0 : i32
    %c0_i32_0 = arith.constant 0 : i32
    %c0_i32_1 = arith.constant 0 : i32
    return %c0_i32, %c0_i32_0 : i32, i32
  }
  func.func @transform_4(%arg0: i32) -> (i32, i32) {
    %c0_i32 = arith.constant 0 : i32
    %c0_i32_0 = arith.constant 0 : i32
    %c0_i32_1 = arith.constant 0 : i32
    return %c0_i32, %c0_i32_0 : i32, i32
  }
  func.func @transform_5(%arg0: i32) -> (i32, i32, i32) {
    %c0_i32 = arith.constant 0 : i32
    %c0_i32_0 = arith.constant 0 : i32
    %c0_i32_1 = arith.constant 0 : i32
    return %arg0, %c0_i32, %c0_i32_0 : i32, i32, i32
  }
}

</mosaic_0001>

<bundles_post_ra>
// kernel: tpu_custom_call.1
= control target key start
LH: loop header
LB: loop body
LE: loop exit
PB: predicated region body
PF: predicated region fallthrough
CT: control target
= control target key end

     0   :  { %10 = vsyncpa [#allocation3], 0  ;;  %s1260_s0 = inlined_call_operand.hbm [shape: bf16[2,8,32], index: 0, kind: input, shape index: {}]   ;;  %s1261_s1 = inlined_call_operand.hbm [shape: bf16[32,96], index: 1, kind: input, shape index: {}]   ;;  %s1262_s2 = inlined_call_operand.vmem [shape: f32[1,96], index: 2, kind: input, shape index: {}]   ;;  %s1263_s3 = inlined_call_operand.hbm [shape: bf16[32,32], index: 3, kind: input, shape index: {}]   ;;  %s1264_s4 = inlined_call_operand.vmem [shape: f32[1,32], index: 4, kind: input, shape index: {}]   ;;  %s1265_s5 = inlined_call_operand.hbm [shape: f32[2,8,32], index: 5, kind: output, shape index: {}]  }
   0x1   :  { %12 = vsyncpa [#allocation3 + $0x1], 0 }
   0x2   :  { %13 = vsyncpa [#allocation6], 0 }
   0x3   :  { %14 = vsyncpa [#allocation4], 0 }
   0x4   :  { %16 = vsyncpa [#allocation4 + $0x1], 0  ;;  %s1066_s18 = smov 0   ;;  %s1068_s19 = smov 0  }
   0x5   :  { %s1070_s20 = smov 0   ;;  %s1072_s21 = smov 0  }
   0x6 LB: > { %s174_s24 = sshll.u32 %s1261_s1, 4  ;;  %s1090_s25 = sadd.s32 4294967295, %s1016_s21   ;;  %s1016_s21 = sphi %s1072_s21, %s1276_s21   ;;  %s1012_s20 = sphi %s1070_s20, %s1275_s20   ;;  %s1008_s19 = sphi %s1068_s19, %s1274_s19   ;;  %s1004_s18 = sphi %s1066_s18, %s1273_s18   ;;  %s175_s24 = int_to_ptr.hbm [resolvable:$true] %s174_s24 }
   0x7   : > { %p710_p0 = scmp.ge.s32.totalorder %s1016_s21, 1  ;;  %p43_p1 = scmp.eq.s32.totalorder %s1090_s25, 0 }
   0x8   : > { %p163_p2 = scmp.lt.s32.totalorder %s1016_s21, 3  ;;  %s1018_s27 = smov [#allocation5]  }
   0x9   : > { %s176_s28 = sshll.u32 %s1018_s27, 4  ;;  %s191_s6 = sshll.u32 %s1263_s3, 4  ;;  %s177_s28 = int_to_ptr.vmem [resolvable:$true] %s176_s28  ;;  %s192_s6 = int_to_ptr.hbm [resolvable:$true] %s191_s6 }
   0xa   : > { %p1095_p3 = pnand %p710_p0, %p163_p2  ;;  %s1019_s7 = smov [#allocation7]  }
   0xb   : > { %s193_s8 = sshll.u32 %s1019_s7, 4  ;;  %s1020_s9 = smov 64   ;;  %s194_s8 = int_to_ptr.vmem [resolvable:$true] %s193_s8 }
   0xc   : > { %p767_p4 = pneg %p1095_p3  ;;  %s1021_s10 = smov 4  }
   0xd   : > { %s709_s11 = sadd.s32 4294967294, %s1016_s21   ;;  %s1109_s12 = sadd.s32 1, %s1016_s21  }
   0xe   : > { %p768_p6 = pnand %p767_p4, %p43_p1  ;;  %s26_s13 = ssub.s32 %s1016_s21, %s1109_s12 }
   0xf   : > { %s29_s14 = sadd.s32 1, %s1012_s20  ;;  %p27_p7 = scmp.eq.s32.totalorder %s26_s13, 0 }
  0x10   : > { %770 = dma.hbm_to_vmem [thread:$0]  (!%p768_p6), %s175_s24, 256, %s177_s28, [#allocation6], %s1020_s9, %s1020_s9, %s1021_s10  }
  0x11   : > { %773 = dma.hbm_to_vmem [thread:$0]  (!%p768_p6), %s192_s6, 256, %s194_s8, [#allocation6], %s1020_s9, %s1020_s9, %s1021_s10  }
  0x12   : > { %p36_p8 = scmp.ne.s32.totalorder %s1012_s20, %s1008_s19  ;;  %p37_p9 = scmp.eq.s32.totalorder %s1016_s21, 0 }
  0x13   : > { %p42_p10 = scmp.ne.s32.totalorder %s1008_s19, %s1004_s18  ;;  %p150_p13 = scmp.eq.s32.totalorder %s1090_s25, 1 }
  0x14   : > { %s1120_s15 = scalar_select %p27_p7, %s1012_s20, %s29_s14  }
  0x15   : > { %p1122_p11 = por %p37_p9, %p36_p8  ;;  %p1128_p12 = por %p43_p1, %p42_p10 }
  0x16   : > { %p156_p0 = scmp.eq.s32.totalorder %s709_s11, 1  ;;  %p784_p2 = scmp.lt.s32.totalorder %s1016_s21, 2 }
  0x17   : > { %s210_s22 = sand.u32 1, %s1012_s20   ;;  %p1135_p4 = por %p150_p13, %p36_p8 }
  0x18   : > { %p1139_p6 = por %p156_p0, %p42_p10  ;;  %s714_s27 = sshll.u32 %s210_s22, 2 }
  0x19   : > { %s715_s28 = sshll.u32 %s1016_s21, 2  ;;  %s214_s7 = scalar_lea.vmem [#allocation2], %s714_s27 }
  0x1a   : > { %s218_s6 = scalar_lea.hbm %s1260_s0, %s715_s28  ;;  %s222_s8 = sshll.u32 %s214_s7, 4  ;;  %s223_s8 = int_to_ptr.vmem [resolvable:$true] %s222_s8 }
  0x1b   : > { %s220_s9 = sshll.u32 %s218_s6, 4  ;;  %p1149_p7 = pnand %p784_p2, %p1122_p11  ;;  %s221_s9 = int_to_ptr.hbm [resolvable:$true] %s220_s9 }
  0x1c   : > { %s211_s11 = scalar_lea.sflag [#allocation3], %s210_s22  ;;  %s916_s13 = sshra.s32 %s221_s9, 4  ;;  %s917_s13 = int_to_ptr.hbm [resolvable:$true] %s916_s13 }
  0x1d   : > { %s918_s14 = scalar_lea.hbm %s917_s13, 4  ;;  %p920_p9 = pneg %p1149_p7 }
  0x1e   : > { %p919_p8 = scmp.ne.s32.totalorder %s917_s13, %s918_s14  ;;  %s923_s29 = scalar_lea.hbm %s1260_s0, 8 }
  0x1f   : > { %p924_p11 = scmp.lt.s32.totalorder %s917_s13, %s1260_s0  ;;  %p925_p0 = scmp.lt.s32.totalorder %s923_s29, %s918_s14 }
  0x20   : > { %p921_p10 = pnand %p920_p9, %p919_p8 }
  0x21   : > { %p926_p2 = por %p925_p0, %p924_p11 }
  0x22   : > { %p922_p13 = pneg %p921_p10 }
  0x24   : > { %p927_p5 = pnand %p926_p2, %p922_p13 }
  0x26   : > { %930 = shalt.err (!%p927_p5)
}
  0x27   : > { %777 = dma.hbm_to_vmem [thread:$0]  (!%p1149_p7), %s221_s9, 64, %s223_s8, %s211_s11  }
  0x28   : > { %231 = sbr.rel (%p1095_p3) target bundleno = 988 (0x3dc), region = 40  ;;  %s1166_s22 = sand.u32 (!%p1095_p3), 1, %s1008_s19  }
  0x29   : > { %s717_s6 = sshll.u32 (!%p1095_p3), %s1166_s22, 2  ;;  %s234_s7 = scalar_lea.sflag (!%p1095_p3), [#allocation3], %s1166_s22 }
  0x2a   : > { %s237_s27 = scalar_lea.vmem (!%p1095_p3), [#allocation2], %s717_s6 }
  0x2d   : > { %991 = dma.done.wait (%p1128_p12), %s234_s7, 64  }
  0x2e   : > { %993 = vsyncadd (%p1128_p12), %s234_s7, 4294967232 }
  0x2f   : > { %995 = dma.done.wait (%p43_p1), [#allocation6], 512  }
  0x30   : > { %997 = vsyncadd (%p43_p1), [#allocation6], 4294966784  ;;  %v752_v0 = vld [vmem:[#allocation5 + $0x8] sm:$0xff]  ;;  %v751_v1 = vld [vmem:[#allocation5] sm:$0xff]  ;;  %vm297_vm0 = vcmask 261120   ;;  %s1022_s17 = smov 104  }
  0x31   : > { %307 = vmatpush.bf16.msra.mxu0 %v752_v0  ;;  %v276_v2 = vld [vmem:[%s237_s27] sm:$0xf]  ;;  %s1023_s9 = smov 120   ;;  %s1024_s10 = smov 96   ;;  %vm318_vm1 = vcmask 64512   ;;  %vm353_vm2 = vcmask 1043456  }
  0x32   : > { %v838_v3 = vld [vmem:[%s1262_s2] ss:$0 sm:$0xff]  ;;  %s1025_s11 = smov 80   ;;  %s1026_s13 = smov 72   ;;  %vm562_vm3 = vcmask 130048   ;;  %vm565_vm4 = vcmask 195584  }
  0x33   : > { %s1027_s14 = smov 88   ;;  %s1028_s28 = smov 64  }
  0x34   : > { %s1029_s29 = smov 112   ;;  %s1030_s30 = smov 56  }
  0x35   : > { %308 = vmatpush.bf16.msra.mxu0 %v751_v1  ;;  %s1031_s16 = smov 48   ;;  %s1032_s6 = smov 40  }
  0x36   : > { %s1033_s7 = smov 8   ;;  %s1034_s27 = smov 16  }
  0x37   : > { %s1035_s26 = smov 24   ;;  %s748_s8 = sshll.u32 %s1090_s25, 3 }
  0x38   : > { %729 = vmatmul.msk.bf16.vlgmr.msra.gmra.mxu0 %vm297_vm0, %v276_v2  ;;  %s605_s25 = scalar_lea.sflag [#allocation4], %s1166_s22 }
  0xb5   : > { %v310_v4 = vpop.f32.mrf.mxu0 }
  0xb6   : > { %v311_v5 = vadd.f32 %v838_v3, %v310_v4 }
  0xb8   : > { %v1182_v6 = vpack.c.bf16 %v311_v5, %v311_v5 }
  0xba   : > { %487 = vrot.lane.b32.xlu2 %v1182_v6, %s1022_s17  ;;  %373 = vrot.lane.b32.xlu1 %v1182_v6, %s1023_s9  ;;  %s720_s17 = sshll.u32 %s1166_s22, 3 }
  0xbb   : > { %316 = vrot.lane.b32.xlu0 %v1182_v6, %s1024_s10 }
  0xbd   : > { %v312_v7 = vpop.f32.mrf.mxu0 }
  0xc2   : > { %432 = vrot.lane.b32.xlu2 %v1182_v6, %s1025_s11  ;;  %489 = vrot.lane.b32.xlu1 %v1182_v6, %s1026_s13  ;;  %s615_s11 = scalar_lea.hbm %s1265_s5, %s748_s8 }
  0xc3   : > { %375 = vrot.lane.b32.xlu0 %v1182_v6, %s1027_s14 }
  0xca   : > { %348 = vrot.lane.b32.xlu2 %v1182_v6, %s1028_s28  ;;  %s274_s28 = scalar_lea.vmem [#allocation8], %s720_s17 }
  0xcb   : > { %430 = vrot.lane.b32.xlu0 %v1182_v6, %s1029_s29  ;;  %s617_s29 = sshll.u32 %s274_s28, 4  ;;  %s618_s29 = int_to_ptr.vmem [resolvable:$true] %s617_s29 }
  0xd2   : > { %406 = vrot.lane.b32.xlu2 %v1182_v6, %s1030_s30  ;;  %s619_s30 = sshll.u32 %s615_s11, 4  ;;  %s620_s30 = int_to_ptr.hbm [resolvable:$true] %s619_s30 }
 0x114   : > { %v488_v8 = vpop.permute.xlu2 %487 }
 0x11c   : > { %v433_v9 = vpop.permute.xlu2 %432 }
 0x11d   : > { %v438_v10 = vsel %vm318_vm1, %v433_v9, 0 }
 0x11e   : > { %447 = vmatpush.bf16.xpose.msrb.mxu0 %v438_v10 }
 0x124   : > { %v349_v11 = vpop.permute.xlu2 %348 }
 0x125   : > { %v355_v12 = vsel %vm353_vm2, %v349_v11, 0 }
 0x126   : > { %364 = vmatpush.bf16.msra.mxu2 %v355_v12 }
 0x12c   : > { %v407_v13 = vpop.permute.xlu2 %406  ;;  %v374_v14 = vpop.permute.xlu1 %373 }
 0x12d   : > { %v317_v15 = vpop.permute.xlu0 %316  ;;  %v412_v16 = vsel %vm353_vm2, %v407_v13, 0 }
 0x12e   : > { %v323_v17 = vsel %vm318_vm1, %v317_v15, 0  ;;  %421 = vmatpush.bf16.msrb.mxu2 %v412_v16 }
 0x12f   : > { %332 = vmatpush.bf16.xpose.msra.mxu1 %v323_v17 }
 0x134   : > { %v490_v18 = vpop.permute.xlu1 %489 }
 0x135   : > { %v376_v19 = vpop.permute.xlu0 %375  ;;  %v495_v20 = vsel %vm318_vm1, %v490_v18, 0 }
 0x136   : > { %730 = vmatmul.msk.bf16.vlgmr.msra.gmra.mxu1 %vm318_vm1, %v1182_v6  ;;  %v381_v21 = vsel %vm318_vm1, %v376_v19, 0 }
 0x137   : > { %390 = vmatpush.bf16.xpose.msra.mxu3 %v381_v21 }
 0x13d   : > { %v431_v22 = vpop.permute.xlu0 %430 }
 0x13e   : > { %732 = vmatmul.msk.bf16.vlgmr.msra.gmra.mxu3 %vm318_vm1, %v374_v14  ;;  %734 = vmatmul.msk.bf16.vlgmr.msrb.gmra.mxu0 %vm318_vm1, %v431_v22 }
 0x13f   : > { %504 = vmatpush.bf16.xpose.msrb.mxu3 %v495_v20 }
 0x14e   : > { %736 = vmatmul.msk.bf16.vlgmr.msrb.gmra.mxu3 %vm318_vm1, %v488_v8 }
 0x1b3   : > { %v334_v23 = vpop.f32.mrf.mxu1 }
 0x1b4   : > { %v338_v24 = vsel %vm318_vm1, %v334_v23, -inf }
 0x1b5   : > { %339 = vmax.xlane.f32.xlu1 %v338_v24 }
 0x1bb   : > { %v336_v25 = vpop.f32.mrf.mxu1  ;;  %v449_v26 = vpop.f32.mrf.mxu0 }
 0x1bc   : > { %v453_v27 = vsel %vm318_vm1, %v449_v26, -inf  ;;  %v754_v25 = vld [vmem:[#allocation7 + $0x8] sm:$0xff] }
 0x1bd   : > { %454 = vmax.xlane.f32.xlu1 %v453_v27  ;;  %596 = vmatpush.bf16.msra.mxu0 %v754_v25 }
 0x1c1   : > { %v392_v28 = vpop.f32.mrf.mxu3 }
 0x1c2   : > { %v396_v29 = vsel %vm318_vm1, %v392_v28, -inf }
 0x1c3   : > { %397 = vmax.xlane.f32.xlu0 %v396_v29  ;;  %v451_v30 = vpop.f32.mrf.mxu0 }
 0x1c9   : > { %v394_v31 = vpop.f32.mrf.mxu3 }
 0x1d1   : > { %v506_v32 = vpop.f32.mrf.mxu3 }
 0x1d2   : > { %v510_v33 = vsel %vm318_vm1, %v506_v32, -inf }
 0x1d3   : > { %511 = vmax.xlane.f32.xlu2 %v510_v33 }
 0x1d6   : > { %463 = vrot.lane.b32.xlu1 %v1182_v6, %s1031_s16  ;;  %s960_s16 = sshra.s32 %s620_s30, 4  ;;  %s961_s16 = int_to_ptr.hbm [resolvable:$true] %s960_s16 }
 0x1d7   : > { %520 = vrot.lane.b32.xlu0 %v1182_v6, %s1032_s6  ;;  %s962_s6 = scalar_lea.hbm %s961_s16, 8  ;;  %p967_p12 = scmp.lt.s32.totalorder %s961_s16, %s1265_s5 }
 0x1d8   : > { %p963_p1 = scmp.ne.s32.totalorder %s961_s16, %s962_s6 }
 0x1d9   : > { %v508_v34 = vpop.f32.mrf.mxu3 }
 0x1da   : > { %p964_p3 = pnand %p963_p1, %p1135_p4 }
 0x1dc   : > { %p965_p5 = pneg %p964_p3 }
 0x228   : > { %v340_v35 = vpop.xlane.xlu1 %339 }
 0x229   : > { %v341_v36 = vsub.f32 %v334_v23, %v340_v35 }
 0x22b   : > { %v342_v37 = vmul.f32 1.442695, %v341_v36 }
 0x22d   : > { %840 = vpow2.f32 %v342_v37  ;;  %v839_v37 = vld [vmem:[%s1264_s4] ss:$0 sm:$0xff] }
 0x230   : > { %v455_v40 = vpop.xlane.xlu1 %454 }
 0x231   : > { %v456_v43 = vsub.f32 %v449_v26, %v455_v40  ;;  %v753_v26 = vld [vmem:[#allocation7] sm:$0xff] }
 0x232   : > { %597 = vmatpush.bf16.msra.mxu0 %v753_v26 }
 0x233   : > { %v841_v38 = vpop.eup %840  ;;  %v457_v45 = vmul.f32 1.442695, %v456_v43 }
 0x234   : > { %v347_v39 = vpack.c.bf16 %v841_v38, %v841_v38  ;;  %v344_v61 = vsel %vm318_vm1, %v841_v38, 0.0 }
 0x236   : > { %731 = vmatmul.msk.bf16.vlgmr.msra.gmra.mxu2 %vm318_vm1, %v347_v39  ;;  %v398_v41 = vpop.xlane.xlu0 %397 }
 0x237   : > { %v399_v42 = vsub.f32 %v392_v28, %v398_v41 }
 0x239   : > { %v400_v44 = vmul.f32 1.442695, %v399_v42 }
 0x23b   : > { %842 = vpow2.f32 %v400_v44 }
 0x23c   : > { %844 = vpow2.f32 %v457_v45 }
 0x241   : > { %v843_v46 = vpop.eup %842 }
 0x242   : > { %v402_v47 = vsel %vm318_vm1, %v843_v46, 0.0  ;;  %v405_v48 = vpack.c.bf16 %v843_v46, %v843_v46  ;;  %v845_v50 = vpop.eup %844 }
 0x243   : > { %403 = vadd.xlane.f32.xlu2 %v402_v47  ;;  %v459_v57 = vsel %vm318_vm1, %v845_v50, 0.0  ;;  %v462_v58 = vpack.c.bf16 %v845_v50, %v845_v50 }
 0x246   : > { %v512_v49 = vpop.xlane.xlu2 %511  ;;  %733 = vmatmul.msk.bf16.vlgmr.msrb.gmra.mxu2 %vm318_vm1, %v405_v48 }
 0x247   : > { %v513_v51 = vsub.f32 %v506_v32, %v512_v49 }
 0x248   : > { %v464_v52 = vpop.permute.xlu1 %463 }
 0x249   : > { %v514_v53 = vmul.f32 1.442695, %v513_v51  ;;  %v521_v54 = vpop.permute.xlu0 %520  ;;  %v469_v55 = vsel %vm353_vm2, %v464_v52, 0 }
 0x24a   : > { %v526_v56 = vsel %vm353_vm2, %v521_v54, 0  ;;  %478 = vmatpush.bf16.msrb.mxu1 %v469_v55 }
 0x24b   : > { %846 = vpow2.f32 %v514_v53  ;;  %460 = vadd.xlane.f32.xlu2 %v459_v57  ;;  %535 = vmatpush.bf16.msra.mxu2 %v526_v56 }
 0x24d   : > { %735 = vmatmul.msk.bf16.vlgmr.msrb.gmra.mxu1 %vm318_vm1, %v462_v58 }
 0x251   : > { %v847_v59 = vpop.eup %846 }
 0x252   : > { %v516_v60 = vsel %vm318_vm1, %v847_v59, 0.0  ;;  %v519_v62 = vpack.c.bf16 %v847_v59, %v847_v59 }
 0x253   : > { %517 = vadd.xlane.f32.xlu0 %v516_v60  ;;  %345 = vadd.xlane.f32.xlu2 %v344_v61 }
 0x256   : > { %737 = vmatmul.msk.bf16.vlgmr.msra.gmra.mxu2 %vm318_vm1, %v519_v62 }
 0x2b6   : > { %v404_v63 = vpop.xlane.xlu2 %403 }
 0x2b7   : > { %848 = vrcp.f32 %v404_v63 }
 0x2b9   : > { %v366_v0 = vpop.f32.mrf.mxu2 }
 0x2bd   : > { %v849_v3 = vpop.eup %848 }
 0x2be   : > { %v461_v1 = vpop.xlane.xlu2 %460 }
 0x2bf   : > { %850 = vrcp.f32 %v461_v1 }
 0x2c1   : > { %v368_v2 = vpop.f32.mrf.mxu2 }
 0x2c5   : > { %v851_v5 = vpop.eup %850 }
 0x2c6   : > { %v518_v13 = vpop.xlane.xlu0 %517  ;;  %v346_v27 = vpop.xlane.xlu2 %345 }
 0x2c7   : > { %852 = vrcp.f32 %v518_v13 }
 0x2c8   : > { %854 = vrcp.f32 %v346_v27 }
 0x2c9   : > { %v423_v4 = vpop.f32.mrf.mxu2 }
 0x2ca   : > { %v428_v6 = vmul.f32 %v849_v3, %v423_v4  ;;  %v480_v7 = vpop.f32.mrf.mxu1 }
 0x2cb   : > { %v485_v8 = vmul.f32 %v851_v5, %v480_v7 }
 0x2cc   : > { %v429_v9 = vpack.c.bf16 %v428_v6, %v428_v6 }
 0x2cd   : > { %v486_v10 = vpack.c.bf16 %v485_v8, %v485_v8  ;;  %v853_v18 = vpop.eup %852 }
 0x2ce   : > { %v545_v11 = vunpack.c.l.b16 %v429_v9  ;;  %v855_v28 = vpop.eup %854 }
 0x2cf   : > { %v550_v12 = vunpack.c.l.b16 %v486_v10  ;;  %v371_v29 = vmul.f32 %v855_v28, %v366_v0 }
 0x2d0   : > { %v546_v14 = vpack.c.b16 %v545_v11, %v545_v11 }
 0x2d1   : > { %v551_v15 = vpack.c.b16 %v550_v12, %v550_v12  ;;  %v425_v16 = vpop.f32.mrf.mxu2  ;;  %v372_v31 = vpack.c.bf16 %v371_v29, %v371_v29 }
 0x2d2   : > { %v482_v17 = vpop.f32.mrf.mxu1  ;;  %547 = vrot.lane.b32.xlu1 %v546_v14, %s1033_s7 }
 0x2d3   : > { %552 = vrot.lane.b32.xlu2 %v551_v15, %s1034_s27 }
 0x2d9   : > { %v537_v19 = vpop.f32.mrf.mxu2 }
 0x2da   : > { %v542_v20 = vmul.f32 %v853_v18, %v537_v19 }
 0x2dc   : > { %v543_v21 = vpack.c.bf16 %v542_v20, %v542_v20 }
 0x2de   : > { %v555_v22 = vunpack.c.l.b16 %v543_v21 }
 0x2e0   : > { %v556_v23 = vpack.c.b16 %v555_v22, %v555_v22 }
 0x2e1   : > { %v539_v24 = vpop.f32.mrf.mxu2 }
 0x2e2   : > { %557 = vrot.lane.b32.xlu1 %v556_v23, %s1035_s26  ;;  %s966_s26 = scalar_lea.hbm %s1265_s5, 16 }
 0x2e3   : > { %p968_p7 = scmp.lt.s32.totalorder %s966_s26, %s962_s6 }
 0x2e5   : > { %p969_p8 = por %p968_p7, %p967_p12 }
 0x2e7   : > { %p970_p9 = pnand %p969_p8, %p965_p5 }
 0x32d   : > { %v553_v33 = vpop.permute.xlu2 %552 }
 0x344   : > { %v548_v30 = vpop.permute.xlu1 %547 }
 0x345   : > { %v561_v32 = vsel %vm318_vm1, %v372_v31, %v548_v30 }
 0x346   : > { %v564_v34 = vsel %vm562_vm3, %v561_v32, %v553_v33 }
 0x354   : > { %v558_v35 = vpop.permute.xlu1 %557 }
 0x355   : > { %v567_v36 = vsel %vm565_vm4, %v564_v34, %v558_v35 }
 0x356   : > { %746 = vmatmul.msk.bf16.vlgmr.msra.gmra.mxu0 %vm297_vm0, %v567_v36 }
 0x3d3   : > { %v599_v38 = vpop.f32.mrf.mxu0 }
 0x3d4   : > { %v600_v39 = vadd.f32 %v839_v37, %v599_v38 }
 0x3d6   : > { %603 = vst.msk [vmem:[%s274_s28] sm:$0xff] %vm297_vm0, %v600_v39 }
 0x3d7   : > { %973 = shalt.err (!%p970_p9)
}
 0x3d8   : > { %765 = dma.vmem_to_hbm [thread:$0]  (%p1135_p4), %s618_s29, 128, %s620_s30, %s605_s25  }
 0x3db   : > { %v601_v40 = vpop.f32.mrf.mxu0 }
 0x3dc PF: > { %s631_s22 = sand.u32 1, %s1004_s18   ;;  %p1272_p10 = scmp.ge.s32.totalorder %s1016_s21, 2 }
 0x3dd   : > { %s632_s9 = scalar_lea.sflag [#allocation4], %s631_s22 }
 0x3de   : > { %p779_p13 = pnand %p1272_p10, %p1139_p6 }
 0x3e0   : > { %p780_p11 = pneg %p779_p13 }
 0x3e2   : > { %999 = dma.done.wait (%p780_p11), %s632_s9, 128  }
 0x3e3   : > { %1001 = vsyncadd (%p780_p11), %s632_s9, 4294967168  ;;  %p19_p0 = scmp.ge.s32.totalorder %s1109_s12, 4   ;;  %s1273_s18 = smov %s1008_s19 }
 0x3e4   : > { %s1274_s19 = smov %s1012_s20  ;;  %s1275_s20 = smov %s1120_s15 }
 0x3e5   : > { %s1276_s21 = smov %s1109_s12  ;;  %21 = sbr.rel (!%p19_p0) target bundleno = 6 (0x6), region = 93 }
 0x3ea   :  { %638 = vsyncpa [#allocation3], 1 }
 0x3eb   :  { %640 = vsyncpa [#allocation3 + $0x1], 1 }
 0x3ec   :  { %641 = vsyncpa [#allocation6], 1 }
 0x3ed   :  { %642 = vsyncpa [#allocation4], 1 }
 0x3ee   :  { %644 = vsyncpa [#allocation4 + $0x1], 1 }

</bundles_post_ra>
